<compile_context>
chip_gen: v5e
topology: v5e:2x2
jax: 0.10.0
libtpu: 0.0.40
codegen_flags: <defaults>
</compile_context>

<pallas_src>
import math

import jax
import jax.numpy as jnp
from jax.experimental import pallas as pl
from jax.experimental.pallas import tpu as pltpu


def _round_up(x, m):
    return ((x + m - 1) // m) * m


def _divisor_tiles(total, max_tile):
    """Multiples of 128 that divide `total` (a multiple of 128), descending,
    capped at max_tile. Never empty for max_tile >= 128."""
    m = total // 128
    out = [128 * d for d in range(m, 0, -1) if m % d == 0 and 128 * d <= max_tile]
    return out or [128]


def _make_kernel(variant, residual, mxu_dtype, x_resident, tk):
    """Kernel body for one (variant, residual, mxu dtype, residency) config."""

    def kernel(*refs):
        scal_ref, adj_ref, x_ref, h0_ref = refs[:4]
        idx = 4
        w_hi_ref = refs[idx]; idx += 1
        w_h0_ref = None
        if variant:
            w_h0_ref = refs[idx]; idx += 1
        xres_ref = None
        if residual:
            xres_ref = refs[idx]; idx += 1
        out_ref = refs[idx]
        hi_acc = refs[idx + 1]            # VMEM (tm, Fi) f32 scratch

        k = pl.program_id(1)

        if x_resident:
            # x lives fully in VMEM; take the current K slice in-kernel.
            start = pl.multiple_of(k * tk, 128)
            x_blk = x_ref[pl.ds(start, tk), :]
        else:
            x_blk = x_ref[...]

        # hi[row_tile] (+)= adj[row_tile, k_tile] @ x[k_tile, :]   (MXU, f32 acc)
        prod = jnp.dot(adj_ref[...], x_blk, preferred_element_type=jnp.float32)

        @pl.when(k == 0)
        def _():                          # write-through: no zero-init store
            hi_acc[...] = prod

        @pl.when(k != 0)
        def _():
            hi_acc[...] += prod

        @pl.when(k == pl.num_programs(1) - 1)
        def _():
            alpha = scal_ref[0]
            theta = scal_ref[1]
            hi = hi_acc[...]
            h0 = h0_ref[...]
            if variant:
                # support = concat([hi, h0], 1)
                # support @ W == hi @ W[:F_in] + h0 @ W[F_in:]
                sw = (jnp.dot(hi.astype(mxu_dtype), w_hi_ref[...],
                              preferred_element_type=jnp.float32)
                      + jnp.dot(h0.astype(mxu_dtype), w_h0_ref[...],
                                preferred_element_type=jnp.float32))
                r = (1.0 - alpha) * hi + alpha * h0
            else:
                support = (1.0 - alpha) * hi + alpha * h0
                sw = jnp.dot(support.astype(mxu_dtype), w_hi_ref[...],
                             preferred_element_type=jnp.float32)
                r = support
            out = theta * sw + (1.0 - theta) * r
            if residual:
                out = out + xres_ref[...]
            out_ref[...] = out.astype(out_ref.dtype)

    return kernel


def graph_convolution(x, adj, h0, weight, lammbda, alpha, l,
                      *, variant=False, residual=False,
                      tm=256, tk=1024, mxu_dtype=jnp.bfloat16,
                      x_resident=None, allow_single_buffer=True):
    """Pallas implementation of GraphConvolution.forward.

    x, h0 : (N, F_in) f32     adj : (N, N) f32 (dense)
    weight: (F_in, F_out), or (2*F_in, F_out) when variant=True
    mxu_dtype: matmul-operand dtype. bf16 is recommended on all generations
               (v5e included: bf16-native MXU + least HBM bandwidth);
               use jnp.float32 for bit-tight accuracy. Accumulation is f32.
    x_resident: None=auto (keep the whole x in VMEM if it fits the budget).
    """
    N, F_in = x.shape
    F_out = weight.shape[1]
    exp_rows = 2 * F_in if variant else F_in
    assert weight.shape[0] == exp_rows, "weight rows do not match variant mode"
    if residual:
        assert F_out == F_in, "residual add requires out_features == in_features"

    theta = math.log(lammbda / l + 1.0)
    scal = jnp.array([alpha, theta], dtype=jnp.float32)

    f32 = jnp.float32
    el = jnp.dtype(mxu_dtype).itemsize
    out_el = jnp.dtype(x.dtype).itemsize
    n_w = 2 if variant else 1

    # Lane-dense padding (minor dims multiples of 128 -> unmasked stores);
    # Np is only 128-aligned (no lcm over-padding).
    Fi = _round_up(F_in, 128)
    Fo = _round_up(F_out, 128)
    Np = _round_up(N, 128)

    # ---- generation-aware VMEM budget ----------------------------------
    try:
        cap = int(pltpu.get_tpu_info().vmem_capacity_bytes)
    except Exception:
        cap = 64 << 20                      # conservative: v7x per-TC VMEM
    budget = int(cap * 0.8)                 # ~51 MiB on v7x, ~102 MiB on v5e/v6e

    SINGLE_BUF_MIN = 2 << 20                # single-buffer big constant blocks

    def _nbuf(nbytes):
        return 1 if (allow_single_buffer and nbytes > SINGLE_BUF_MIN) else 2

    def _footprint(tm_, tk_, x_res_):
        fp = 2 * tm_ * tk_ * el                           # adj tile (2 bufs)
        if x_res_:
            fp += _nbuf(Np * Fi * el) * Np * Fi * el      # resident x
        else:
            fp += 2 * tk_ * Fi * el                       # streamed x tile
        fp += _nbuf(tm_ * Fi * 4) * tm_ * Fi * 4          # h0 row tile (f32)
        fp += n_w * _nbuf(Fi * Fo * el) * Fi * Fo * el    # weight block(s)
        if residual:
            fp += _nbuf(tm_ * Fo * 4) * tm_ * Fo * 4      # residual row tile
        fp += 2 * tm_ * Fo * out_el                       # output tile
        fp += tm_ * Fi * 4                                # hi accumulator
        return fp

    if x_resident is None:
        x_resident = _footprint(128, 128, True) <= budget

    tm_cap = max(128, _round_up(min(tm, Np), 128))
    if Np >= 256:
        tm_cap = min(tm_cap, Np // 2)       # >=2 row tiles -> both v7x TCs busy
    tk_cap = max(128, _round_up(min(tk, Np), 128))

    def _choose(x_res_):
        for tm_ in _divisor_tiles(Np, tm_cap):
            for tk_ in _divisor_tiles(Np, tk_cap):
                if _footprint(tm_, tk_, x_res_) <= budget:
                    return tm_, tk_
        return None

    chosen = _choose(x_resident)
    if chosen is None and x_resident:
        x_resident = False
        chosen = _choose(False)
    if chosen is None:
        chosen = (128, 128)
    tm, tk = chosen

    # ---- pad + cast in one step (no padded f32 copy of adj) ------------
    def _pad2(a, r, c):
        if r == 0 and c == 0:
            return a
        return jnp.pad(a, ((0, r), (0, c)))

    adj_p = _pad2(adj.astype(mxu_dtype), Np - N, Np - N)
    x_mm = _pad2(x.astype(mxu_dtype), Np - N, Fi - F_in)
    h0_p = _pad2(h0.astype(f32), Np - N, Fi - F_in)

    w = weight.astype(mxu_dtype)
    if variant:
        w_hi = _pad2(w[:F_in], Fi - F_in, Fo - F_out)
        w_h0 = _pad2(w[F_in:], Fi - F_in, Fo - F_out)
    else:
        w_hi = _pad2(w, Fi - F_in, Fo - F_out)
        w_h0 = None
    x_res_arr = _pad2(x.astype(f32), Np - N, Fo - F_out) if residual else None

    # ---- BlockSpecs ------------------------------------------------------
    def _spec(shape, index_map, nbytes):
        if _nbuf(nbytes) == 1:
            return pl.BlockSpec(shape, index_map, pipeline_mode=pl.Buffered(1))
        return pl.BlockSpec(shape, index_map)

    in_specs = [pl.BlockSpec(memory_space=pltpu.MemorySpace.SMEM)]   # [alpha, theta]
    args = [scal]

    in_specs.append(pl.BlockSpec((tm, tk), lambda i, k: (i, k)))     # adj tile
    args.append(adj_p)

    if x_resident:                                                    # x (matmul RHS)
        in_specs.append(_spec((Np, Fi), lambda i, k: (0, 0), Np * Fi * el))
    else:
        in_specs.append(pl.BlockSpec((tk, Fi), lambda i, k: (k, 0)))
    args.append(x_mm)

    in_specs.append(_spec((tm, Fi), lambda i, k: (i, 0), tm * Fi * 4))  # h0 rows
    args.append(h0_p)

    in_specs.append(_spec((Fi, Fo), lambda i, k: (0, 0), Fi * Fo * el))  # W / W[:F_in]
    args.append(w_hi)
    if variant:
        in_specs.append(_spec((Fi, Fo), lambda i, k: (0, 0), Fi * Fo * el))  # W[F_in:]
        args.append(w_h0)
    if residual:
        in_specs.append(_spec((tm, Fo), lambda i, k: (i, 0), tm * Fo * 4))   # x rows
        args.append(x_res_arr)

    # ---- advisory cost estimate (honest about x traffic) ----------------
    f_in_eff = (2 * Fi) if variant else Fi
    flops = 2 * Np * Np * Fi + 2 * Np * f_in_eff * Fo
    x_bytes = Np * Fi * el if x_resident else (Np // tm) * Np * Fi * el
    bytes_accessed = (Np * Np * el + x_bytes + Np * Fi * 4
                      + n_w * Fi * Fo * el + Np * Fo * out_el
                      + (Np * Fo * 4 if residual else 0))

    fp = _footprint(tm, tk, x_resident)
    vmem_limit = int(min(cap - (8 << 20), max(32 << 20, fp + (4 << 20))))
    vmem_limit = max(vmem_limit, fp + (1 << 20))

    grid = (Np // tm, Np // tk)   # rows parallel (megacore), K reduction last

    out = pl.pallas_call(
        _make_kernel(variant, residual, mxu_dtype, x_resident, tk),
        out_shape=jax.ShapeDtypeStruct((Np, Fo), x.dtype),
        grid=grid,
        in_specs=in_specs,
        out_specs=pl.BlockSpec((tm, Fo), lambda i, k: (i, 0)),
        scratch_shapes=[pltpu.VMEM((tm, Fi), jnp.float32)],   # hi accumulator
        compiler_params=pltpu.CompilerParams(
            dimension_semantics=("parallel", "arbitrary"),
            vmem_limit_bytes=vmem_limit),
        cost_estimate=pl.CostEstimate(flops=flops, transcendentals=0,
                                      bytes_accessed=bytes_accessed),
    )(*args)

    return out[:N, :F_out]


def _reference(x, adj, h0, weight, lammbda, alpha, l, variant, residual):
    theta = math.log(lammbda / l + 1.0)
    hi = adj @ x
    if variant:
        support = jnp.concatenate([hi, h0], axis=1)
        r = (1.0 - alpha) * hi + alpha * h0
    else:
        support = (1.0 - alpha) * hi + alpha * h0
        r = support
    out = theta * (support @ weight) + (1.0 - theta) * r
    if residual:
        out = out + x
    return out


def _make_inputs(key, n, f, variant):
    k_adj, k_x, k_h0, k_w = jax.random.split(key, 4)
    a = jax.random.uniform(k_adj, (n, n), dtype=jnp.float32)
    adj = (a + a.T) / (2.0 * n)                       # symmetric, normalized-ish
    x = jax.random.normal(k_x, (n, f), dtype=jnp.float32)
    h0 = jax.random.normal(k_h0, (n, f), dtype=jnp.float32)
    stdv = 1.0 / math.sqrt(f)
    rows = 2 * f if variant else f
    w = jax.random.uniform(k_w, (rows, f), minval=-stdv, maxval=stdv,
                           dtype=jnp.float32)
    return x, adj, h0, w


if __name__ == "__main__":
    lammbda, alpha, l = 0.5, 0.1, 2.0
    key = jax.random.PRNGKey(0)
    k1, k2, k3, k4 = jax.random.split(key, 4)

    # 1) small, variant=False, residual=True, f32 MXU (single tile, resident x)
    x, adj, h0, w = _make_inputs(k1, 64, 32, variant=False)
    out = graph_convolution(x, adj, h0, w, lammbda, alpha, l,
                            variant=False, residual=True,
                            mxu_dtype=jnp.float32)
    jax.block_until_ready(out)
    ref = _reference(x, adj, h0, w, lammbda, alpha, l, False, True)
    assert jnp.allclose(out, ref, atol=1e-4, rtol=1e-4)

    # 2) variant=True, residual=False, f32 MXU, streamed-x + K accumulation path
    x, adj, h0, w = _make_inputs(k2, 256, 48, variant=True)
    out = graph_convolution(x, adj, h0, w, lammbda, alpha, l,
                            variant=True, residual=False,
                            tm=128, tk=128, mxu_dtype=jnp.float32,
                            x_resident=False)
    jax.block_until_ready(out)
    ref = _reference(x, adj, h0, w, lammbda, alpha, l, True, False)
    assert jnp.allclose(out, ref, atol=1e-4, rtol=1e-4)

    # 3) variant=False, residual=False, f32 MXU, resident-x with K>1 (in-kernel slicing)
    x, adj, h0, w = _make_inputs(k3, 256, 32, variant=False)
    out = graph_convolution(x, adj, h0, w, lammbda, alpha, l,
                            variant=False, residual=False,
                            tm=128, tk=128, mxu_dtype=jnp.float32,
                            x_resident=True)
    jax.block_until_ready(out)
    ref = _reference(x, adj, h0, w, lammbda, alpha, l, False, False)
    assert jnp.allclose(out, ref, atol=1e-4, rtol=1e-4)

    # 4) non-aligned N, variant=True, residual=True, bf16 fast path (defaults)
    x, adj, h0, w = _make_inputs(k4, 200, 32, variant=True)
    out = graph_convolution(x, adj, h0, w, lammbda, alpha, l,
                            variant=True, residual=True,
                            mxu_dtype=jnp.bfloat16)
    jax.block_until_ready(out)
    ref = _reference(x, adj, h0, w, lammbda, alpha, l, True, True)
    assert jnp.allclose(out, ref, atol=3e-2, rtol=3e-2)

    print("KERNEL_OK")
</pallas_src>

<mosaic_0001>
module attributes {stable_mosaic.version = 11 : i64} {
  func.func @kernel(%arg0: i32, %arg1: i32, %arg2: memref<2xf32, #tpu.memory_space<smem>>, %arg3: memref<128x128xf32, #tpu.memory_space<vmem>>, %arg4: memref<128x128xf32, #tpu.memory_space<vmem>>, %arg5: memref<128x128xf32, #tpu.memory_space<vmem>>, %arg6: memref<128x128xf32, #tpu.memory_space<vmem>>, %arg7: memref<128x128xf32, #tpu.memory_space<vmem>>, %arg8: memref<128x128xf32, #tpu.memory_space<vmem>>, %arg9: memref<128x128xf32, #tpu.memory_space<vmem>>) attributes {dimension_semantics = [#tpu.dimension_semantics<parallel>, #tpu.dimension_semantics<arbitrary>], iteration_bounds = array<i64: 1, 1>, scalar_prefetch = 0 : i64, scratch_operands = 1 : i64, tpu.core_type = #tpu.core_type<tc>, window_params = [{transform_indices = @transform_0, window_bounds = array<i64: 2>}, {transform_indices = @transform_1, window_bounds = array<i64: 128, 128>}, {pipeline_mode = #tpu.pipeline_mode<synchronous>, transform_indices = @transform_2, window_bounds = array<i64: 128, 128>}, {transform_indices = @transform_3, window_bounds = array<i64: 128, 128>}, {pipeline_mode = #tpu.pipeline_mode<synchronous>, transform_indices = @transform_4, window_bounds = array<i64: 128, 128>}, {transform_indices = @transform_5, window_bounds = array<i64: 128, 128>}, {transform_indices = @transform_6, window_bounds = array<i64: 128, 128>}]} {
    %c128_i32 = arith.constant 128 : i32
    %0 = arith.muli %arg1, %c128_i32 : i32
    %1 = tpu.assume_multiple %0, 128 : i32
    %2 = arith.index_cast %1 : i32 to index
    %c0 = arith.constant 0 : index
    %3 = vector.load %arg4[%2, %c0] : memref<128x128xf32, #tpu.memory_space<vmem>>, vector<128x128xf32>
    %c0_0 = arith.constant 0 : index
    %c0_1 = arith.constant 0 : index
    %4 = vector.load %arg3[%c0_0, %c0_1] : memref<128x128xf32, #tpu.memory_space<vmem>>, vector<128x128xf32>
    %cst = arith.constant dense<0.000000e+00> : vector<128x128xf32>
    %5 = tpu.matmul %4, %3, %cst {dimension_numbers = #tpu.dot_dimension_numbers<[1], [0], [0], [1], [0, 0, 1, 1], [], []>} : vector<128x128xf32>, vector<128x128xf32>, vector<128x128xf32> -> vector<128x128xf32>
    %c0_i32 = arith.constant 0 : i32
    %6 = arith.cmpi eq, %arg1, %c0_i32 : i32
    %7 = arith.extui %6 : i1 to i32
    %c0_i32_2 = arith.constant 0 : i32
    %8 = arith.cmpi ne, %7, %c0_i32_2 : i32
    scf.if %8 {
      %c0_7 = arith.constant 0 : index
      %c0_8 = arith.constant 0 : index
      %15 = vector.load %arg9[%c0_7, %c0_8] : memref<128x128xf32, #tpu.memory_space<vmem>>, vector<128x128xf32>
      tpu.vector_store %arg9[%c0_7, %c0_8], %5 {strides = array<i32>} : memref<128x128xf32, #tpu.memory_space<vmem>>, vector<128x128xf32>,
    } else {
    }
    %c0_i32_3 = arith.constant 0 : i32
    %9 = arith.cmpi ne, %arg1, %c0_i32_3 : i32
    %10 = arith.extui %9 : i1 to i32
    %c0_i32_4 = arith.constant 0 : i32
    %11 = arith.cmpi ne, %10, %c0_i32_4 : i32
    scf.if %11 {
      %c0_7 = arith.constant 0 : index
      %c0_8 = arith.constant 0 : index
      %15 = vector.load %arg9[%c0_7, %c0_8] : memref<128x128xf32, #tpu.memory_space<vmem>>, vector<128x128xf32>
      %16 = arith.addf %15, %5 : vector<128x128xf32>
      %c0_9 = arith.constant 0 : index
      %c0_10 = arith.constant 0 : index
      %17 = vector.load %arg9[%c0_9, %c0_10] : memref<128x128xf32, #tpu.memory_space<vmem>>, vector<128x128xf32>
      tpu.vector_store %arg9[%c0_9, %c0_10], %16 {strides = array<i32>} : memref<128x128xf32, #tpu.memory_space<vmem>>, vector<128x128xf32>,
    } else {
    }
    %c0_i32_5 = arith.constant 0 : i32
    %12 = arith.cmpi eq, %arg1, %c0_i32_5 : i32
    %13 = arith.extui %12 : i1 to i32
    %c0_i32_6 = arith.constant 0 : i32
    %14 = arith.cmpi ne, %13, %c0_i32_6 : i32
    scf.if %14 {
      %c0_7 = arith.constant 0 : index
      %15 = memref.load %arg2[%c0_7] : memref<2xf32, #tpu.memory_space<smem>>
      %c1 = arith.constant 1 : index
      %16 = memref.load %arg2[%c1] : memref<2xf32, #tpu.memory_space<smem>>
      %c0_8 = arith.constant 0 : index
      %c0_9 = arith.constant 0 : index
      %17 = vector.load %arg9[%c0_8, %c0_9] : memref<128x128xf32, #tpu.memory_space<vmem>>, vector<128x128xf32>
      %c0_10 = arith.constant 0 : index
      %c0_11 = arith.constant 0 : index
      %18 = vector.load %arg5[%c0_10, %c0_11] : memref<128x128xf32, #tpu.memory_space<vmem>>, vector<128x128xf32>
      %cst_12 = arith.constant 1.000000e+00 : f32
      %19 = arith.subf %cst_12, %15 : f32
      %20 = vector.broadcast %19 : f32 to vector<128x128xf32>
      %21 = arith.mulf %20, %17 : vector<128x128xf32>
      %22 = vector.broadcast %15 : f32 to vector<128x128xf32>
      %23 = arith.mulf %22, %18 : vector<128x128xf32>
      %24 = arith.addf %21, %23 : vector<128x128xf32>
      %c0_13 = arith.constant 0 : index
      %c0_14 = arith.constant 0 : index
      %25 = vector.load %arg6[%c0_13, %c0_14] : memref<128x128xf32, #tpu.memory_space<vmem>>, vector<128x128xf32>
      %cst_15 = arith.constant dense<0.000000e+00> : vector<128x128xf32>
      %26 = tpu.matmul %24, %25, %cst_15 {dimension_numbers = #tpu.dot_dimension_numbers<[1], [0], [0], [1], [0, 0, 1, 1], [], []>} : vector<128x128xf32>, vector<128x128xf32>, vector<128x128xf32> -> vector<128x128xf32>
      %27 = vector.broadcast %16 : f32 to vector<128x128xf32>
      %28 = arith.mulf %27, %26 : vector<128x128xf32>
      %cst_16 = arith.constant 1.000000e+00 : f32
      %29 = arith.subf %cst_16, %16 : f32
      %30 = vector.broadcast %29 : f32 to vector<128x128xf32>
      %31 = arith.mulf %30, %24 : vector<128x128xf32>
      %32 = arith.addf %28, %31 : vector<128x128xf32>
      %c0_17 = arith.constant 0 : index
      %c0_18 = arith.constant 0 : index
      %33 = vector.load %arg7[%c0_17, %c0_18] : memref<128x128xf32, #tpu.memory_space<vmem>>, vector<128x128xf32>
      %34 = arith.addf %32, %33 : vector<128x128xf32>
      %c0_19 = arith.constant 0 : index
      %c0_20 = arith.constant 0 : index
      %35 = vector.load %arg8[%c0_19, %c0_20] : memref<128x128xf32, #tpu.memory_space<vmem>>, vector<128x128xf32>
      tpu.vector_store %arg8[%c0_19, %c0_20], %34 {strides = array<i32>} : memref<128x128xf32, #tpu.memory_space<vmem>>, vector<128x128xf32>,
    } else {
    }
    return
  }
  func.func @transform_0(%arg0: i32, %arg1: i32) -> i32 {
    %c0_i32 = arith.constant 0 : i32
    %c0_i32_0 = arith.constant 0 : i32
    return %c0_i32 : i32
  }
  func.func @transform_1(%arg0: i32, %arg1: i32) -> (i32, i32) {
    %c0_i32 = arith.constant 0 : i32
    return %arg0, %arg1 : i32, i32
  }
  func.func @transform_2(%arg0: i32, %arg1: i32) -> (i32, i32) {
    %c0_i32 = arith.constant 0 : i32
    %c0_i32_0 = arith.constant 0 : i32
    %c0_i32_1 = arith.constant 0 : i32
    return %c0_i32, %c0_i32_0 : i32, i32
  }
  func.func @transform_3(%arg0: i32, %arg1: i32) -> (i32, i32) {
    %c0_i32 = arith.constant 0 : i32
    %c0_i32_0 = arith.constant 0 : i32
    return %arg0, %c0_i32 : i32, i32
  }
  func.func @transform_4(%arg0: i32, %arg1: i32) -> (i32, i32) {
    %c0_i32 = arith.constant 0 : i32
    %c0_i32_0 = arith.constant 0 : i32
    %c0_i32_1 = arith.constant 0 : i32
    return %c0_i32, %c0_i32_0 : i32, i32
  }
  func.func @transform_5(%arg0: i32, %arg1: i32) -> (i32, i32) {
    %c0_i32 = arith.constant 0 : i32
    %c0_i32_0 = arith.constant 0 : i32
    return %arg0, %c0_i32 : i32, i32
  }
  func.func @transform_6(%arg0: i32, %arg1: i32) -> (i32, i32) {
    %c0_i32 = arith.constant 0 : i32
    %c0_i32_0 = arith.constant 0 : i32
    return %arg0, %c0_i32 : i32, i32
  }
}

</mosaic_0001>

<bundles_post_ra>
// kernel: tpu_custom_call.1
= control target key start
LH: loop header
LB: loop body
LE: loop exit
PB: predicated region body
PF: predicated region fallthrough
CT: control target
= control target key end

     0   :  { %11 = vsyncpa [#allocation6], 0  ;;  %s1002_s0 = inlined_call_operand.hbm [shape: f32[2], index: 0, kind: input, shape index: {}]   ;;  %s1003_s1 = inlined_call_operand.hbm [shape: f32[128,128], index: 1, kind: input, shape index: {}]   ;;  %s1004_s2 = inlined_call_operand.hbm [shape: f32[128,128], index: 2, kind: input, shape index: {}]   ;;  %s1005_s3 = inlined_call_operand.hbm [shape: f32[128,128], index: 3, kind: input, shape index: {}]   ;;  %s1006_s4 = inlined_call_operand.hbm [shape: f32[128,128], index: 4, kind: input, shape index: {}]   ;;  %s1007_s5 = inlined_call_operand.hbm [shape: f32[128,128], index: 5, kind: input, shape index: {}]   ;;  %s1008_s6 = inlined_call_operand.hbm [shape: f32[128,128], index: 6, kind: output, shape index: {}]  }
   0x1   :  { %12 = vsyncpa [#allocation4], 0 }
   0x2   :  { %13 = vsyncpa [#allocation9], 0 }
   0x3   :  { %14 = vsyncpa [#allocation12], 0 }
   0x4   :  { %15 = vsyncpa [#allocation5], 0  ;;  %s42_s23 = sshll.u32 %s1004_s2, 4  ;;  %s784_s24 = smov [#allocation8]   ;;  %s43_s23 = int_to_ptr.hbm [resolvable:$true] %s42_s23 }
   0x5   :  { %s44_s25 = sshll.u32 %s784_s24, 4  ;;  %s68_s28 = sshll.u32 %s1006_s4, 4  ;;  %s45_s25 = int_to_ptr.vmem [resolvable:$true] %s44_s25  ;;  %s69_s28 = int_to_ptr.hbm [resolvable:$true] %s68_s28 }
   0x6   :  { %s785_s29 = smov 128   ;;  %s786_s30 = smov 8  }
   0x7   :  { %50 = dma.hbm_to_vmem [thread:$0]  %s43_s23, 2048, %s45_s25, [#allocation9], %s785_s29, %s785_s29, %s786_s30  }
   0x8   :  { %s787_s7 = smov [#allocation11]   ;;  %s21_s2 = sshll.u32 %s1002_s0, 4  ;;  %s22_s2 = int_to_ptr.hbm [resolvable:$true] %s21_s2 }
   0x9   :  { %s70_s8 = sshll.u32 %s787_s7, 4  ;;  %s29_s12 = sshll.u32 %s1003_s1, 4  ;;  %s71_s8 = int_to_ptr.vmem [resolvable:$true] %s70_s8  ;;  %s30_s12 = int_to_ptr.hbm [resolvable:$true] %s29_s12 }
   0xa   :  { %76 = dma.hbm_to_vmem [thread:$0]  %s69_s28, 2048, %s71_s8, [#allocation12], %s785_s29, %s785_s29, %s786_s30  }
   0xb   :  { %s788_s13 = smov [#allocation3]   ;;  %s789_s14 = smov [#allocation7]  }
   0xc   :  { %24 = dma.hbm_to_smem %s22_s2, 16, %s788_s13, [#allocation6]  }
   0xd   :  { %s31_s15 = sshll.u32 %s789_s14, 4  ;;  %s55_s18 = sshll.u32 %s1005_s3, 4  ;;  %s32_s15 = int_to_ptr.vmem [resolvable:$true] %s31_s15  ;;  %s56_s18 = int_to_ptr.hbm [resolvable:$true] %s55_s18 }
   0xe   :  { %37 = dma.hbm_to_vmem [thread:$0]  %s30_s12, 2048, %s32_s15, [#allocation4], %s785_s29, %s785_s29, %s786_s30  }
   0xf   :  { %s81_s20 = sshll.u32 %s1007_s5, 4  ;;  %s790_s1 = smov [#allocation10]   ;;  %s82_s20 = int_to_ptr.hbm [resolvable:$true] %s81_s20 }
  0x10   :  { %s57_s21 = sshll.u32 %s790_s1, 4  ;;  %s791_s22 = smov [#allocation13]   ;;  %s58_s21 = int_to_ptr.vmem [resolvable:$true] %s57_s21 }
  0x11   :  { %63 = dma.hbm_to_vmem [thread:$0]  %s56_s18, 2048, %s58_s21, [#allocation9], %s785_s29, %s785_s29, %s786_s30  }
  0x12   :  { %s83_s3 = sshll.u32 %s791_s22, 4  ;;  %s84_s3 = int_to_ptr.vmem [resolvable:$true] %s83_s3 }
  0x13   :  { %89 = dma.hbm_to_vmem [thread:$0]  %s82_s20, 2048, %s84_s3, [#allocation12], %s785_s29, %s785_s29, %s786_s30  }
  0x14   :  { %774 = dma.done.wait [#allocation6], 16  }
  0x15   :  { %775 = vsyncadd [#allocation6], 4294967280 }
  0x16   :  { %776 = dma.done.wait [#allocation4], 2048  }
  0x17   :  { %777 = vsyncadd [#allocation4], 4294965248 }
  0x18   :  { %778 = dma.done.wait [#allocation9], 4096  }
  0x19   :  { %779 = vsyncadd [#allocation9], 4294963200 }
  0x1a   :  { %780 = dma.done.wait [#allocation12], 4096  }
  0x1b   :  { %781 = vsyncadd [#allocation12], 4294963200 }
  0x1c   :  { %114 = sfence }
  0x1d   :  { %v132_v0 = vld [vmem:[#allocation8 + $0x78] sm:$0xff]  ;;  %v131_v1 = vld [vmem:[#allocation8 + $0x70] sm:$0xff]  ;;  %v130_v2 = vld [vmem:[#allocation8 + $0x68] sm:$0xff]  ;;  %s289_s5 = sld [smem:[#allocation3]]  ;;  %s792_s26 = smov [#allocation14]  }
  0x1e   :  { %149 = vmatpush.msra.mxu0 %v132_v0  ;;  %577 = vmatpush.msra.mxu2 %v132_v0  ;;  %v129_v3 = vld [vmem:[#allocation8 + $0x60] sm:$0xff]  ;;  %v128_v4 = vld [vmem:[#allocation8 + $0x58] sm:$0xff]  ;;  %v127_v5 = vld [vmem:[#allocation8 + $0x50] sm:$0xff]  ;;  %s576_s24 = sld [smem:[#allocation3 + $0x1]]  ;;  %s558_s27 = sshll.u32 %s792_s26, 4  ;;  %s559_s27 = int_to_ptr.vmem [resolvable:$true] %s558_s27 }
  0x1f   :  { %v126_v6 = vld [vmem:[#allocation8 + $0x48] sm:$0xff]  ;;  %v125_v7 = vld [vmem:[#allocation8 + $0x40] sm:$0xff]  ;;  %v124_v8 = vld [vmem:[#allocation8 + $0x38] sm:$0xff]  ;;  %s560_s8 = sshll.u32 %s1008_s6, 4  ;;  %s561_s8 = int_to_ptr.hbm [resolvable:$true] %s560_s8 }
  0x20   :  { %150 = vmatpush.msra.mxu0 %v131_v1  ;;  %578 = vmatpush.msra.mxu2 %v131_v1  ;;  %v123_v9 = vld [vmem:[#allocation8 + $0x30] sm:$0xff]  ;;  %v122_v10 = vld [vmem:[#allocation8 + $0x28] sm:$0xff]  ;;  %v121_v11 = vld [vmem:[#allocation8 + $0x20] sm:$0xff] }
  0x21   :  { %v120_v12 = vld [vmem:[#allocation8 + $0x18] sm:$0xff]  ;;  %v119_v13 = vld [vmem:[#allocation8 + $0x10] sm:$0xff]  ;;  %v118_v14 = vld [vmem:[#allocation8 + $0x8] sm:$0xff] }
  0x22   :  { %151 = vmatpush.msra.mxu0 %v130_v2  ;;  %579 = vmatpush.msra.mxu2 %v130_v2  ;;  %v117_v15 = vld [vmem:[#allocation8] sm:$0xff]  ;;  %v134_v18 = vld [vmem:[#allocation7 + $0x8] sm:$0xff]  ;;  %v135_v20 = vld [vmem:[#allocation7 + $0x10] sm:$0xff] }
  0x23   :  { %v133_v16 = vld [vmem:[#allocation7] sm:$0xff]  ;;  %v142_v19 = vld [vmem:[#allocation7 + $0x48] sm:$0xff]  ;;  %v143_v21 = vld [vmem:[#allocation7 + $0x50] sm:$0xff]  ;;  %s323_s23 = ssub.f32 1.0, %s289_s5  ;;  %v861_v49 = vstv %s289_s5 }
  0x24   :  { %152 = vmatpush.msra.mxu0 %v129_v3  ;;  %580 = vmatpush.msra.mxu2 %v129_v3  ;;  %v141_v17 = vld [vmem:[#allocation7 + $0x40] sm:$0xff]  ;;  %v136_v22 = vld [vmem:[#allocation7 + $0x18] sm:$0xff]  ;;  %v388_v25 = vld [vmem:[#allocation11 + $0x70] sm:$0xff]  ;;  %s472_s25 = ssub.f32 1.0, %s576_s24 }
  0x25   :  { %v144_v23 = vld [vmem:[#allocation7 + $0x58] sm:$0xff]  ;;  %v387_v26 = vld [vmem:[#allocation11 + $0x68] sm:$0xff]  ;;  %v386_v27 = vld [vmem:[#allocation11 + $0x60] sm:$0xff]  ;;  %v863_v50 = vstv %s323_s23 }
  0x26   :  { %153 = vmatpush.msra.mxu0 %v128_v4  ;;  %581 = vmatpush.msra.mxu2 %v128_v4  ;;  %v389_v24 = vld [vmem:[#allocation11 + $0x78] sm:$0xff]  ;;  %v137_v28 = vld [vmem:[#allocation7 + $0x20] sm:$0xff]  ;;  %v384_v31 = vld [vmem:[#allocation11 + $0x50] sm:$0xff] }
  0x27   :  { %390 = vmatpush.msra.mxu1 %v389_v24  ;;  %593 = vmatpush.msra.mxu3 %v389_v24  ;;  %v145_v29 = vld [vmem:[#allocation7 + $0x60] sm:$0xff]  ;;  %v385_v30 = vld [vmem:[#allocation11 + $0x58] sm:$0xff]  ;;  %v383_v32 = vld [vmem:[#allocation11 + $0x48] sm:$0xff] }
  0x28   :  { %154 = vmatpush.msra.mxu0 %v127_v5  ;;  %582 = vmatpush.msra.mxu2 %v127_v5  ;;  %v382_v33 = vld [vmem:[#allocation11 + $0x40] sm:$0xff]  ;;  %v138_v34 = vld [vmem:[#allocation7 + $0x28] sm:$0xff]  ;;  %v381_v36 = vld [vmem:[#allocation11 + $0x38] sm:$0xff] }
  0x29   :  { %391 = vmatpush.msra.mxu1 %v388_v25  ;;  %594 = vmatpush.msra.mxu3 %v388_v25  ;;  %v146_v35 = vld [vmem:[#allocation7 + $0x68] sm:$0xff]  ;;  %v380_v37 = vld [vmem:[#allocation11 + $0x30] sm:$0xff]  ;;  %v378_v39 = vld [vmem:[#allocation11 + $0x20] sm:$0xff] }
  0x2a   :  { %155 = vmatpush.msra.mxu0 %v126_v6  ;;  %583 = vmatpush.msra.mxu2 %v126_v6  ;;  %v379_v38 = vld [vmem:[#allocation11 + $0x28] sm:$0xff]  ;;  %v139_v40 = vld [vmem:[#allocation7 + $0x30] sm:$0xff]  ;;  %v377_v42 = vld [vmem:[#allocation11 + $0x18] sm:$0xff] }
  0x2b   :  { %392 = vmatpush.msra.mxu1 %v387_v26  ;;  %595 = vmatpush.msra.mxu3 %v387_v26  ;;  %v147_v41 = vld [vmem:[#allocation7 + $0x70] sm:$0xff]  ;;  %v140_v43 = vld [vmem:[#allocation7 + $0x38] sm:$0xff]  ;;  %v375_v46 = vld [vmem:[#allocation11 + $0x8] sm:$0xff] }
  0x2c   :  { %156 = vmatpush.msra.mxu0 %v125_v7  ;;  %584 = vmatpush.msra.mxu2 %v125_v7  ;;  %v148_v44 = vld [vmem:[#allocation7 + $0x78] sm:$0xff]  ;;  %v376_v45 = vld [vmem:[#allocation11 + $0x10] sm:$0xff]  ;;  %v374_v47 = vld [vmem:[#allocation11] sm:$0xff] }
  0x2d   :  { %393 = vmatpush.msra.mxu1 %v386_v27  ;;  %596 = vmatpush.msra.mxu3 %v386_v27  ;;  %v307_v48 = vld [vmem:[#allocation10] sm:$0xff]  ;;  %v308_v56 = vld [vmem:[#allocation10 + $0x8] sm:$0xff]  ;;  %v309_v2 = vld [vmem:[#allocation10 + $0x10] sm:$0xff] }
  0x2e   :  { %157 = vmatpush.msra.mxu0 %v124_v8  ;;  %585 = vmatpush.msra.mxu2 %v124_v8  ;;  %v342_v51 = vmul.f32 %v861_v49, %v307_v48  ;;  %v315_v54 = vld [vmem:[#allocation10 + $0x40] sm:$0xff]  ;;  %v343_v60 = vmul.f32 %v861_v49, %v308_v56  ;;  %v316_v0 = vld [vmem:[#allocation10 + $0x48] sm:$0xff]  ;;  %v344_v6 = vmul.f32 %v861_v49, %v309_v2 }
  0x2f   :  { %394 = vmatpush.msra.mxu1 %v385_v30  ;;  %597 = vmatpush.msra.mxu3 %v385_v30  ;;  %v350_v57 = vmul.f32 %v861_v49, %v315_v54  ;;  %v351_v3 = vmul.f32 %v861_v49, %v316_v0  ;;  %v319_v30 = vld [vmem:[#allocation10 + $0x60] sm:$0xff]  ;;  %v314_v54 = vld [vmem:[#allocation10 + $0x38] sm:$0xff] }
  0x30   :  { %158 = vmatpush.msra.mxu0 %v123_v9  ;;  %586 = vmatpush.msra.mxu2 %v123_v9  ;;  %v322_v0 = vld [vmem:[#allocation10 + $0x78] sm:$0xff] }
  0x31   :  { %395 = vmatpush.msra.mxu1 %v384_v31  ;;  %598 = vmatpush.msra.mxu3 %v384_v31 }
  0x32   :  { %159 = vmatpush.msra.mxu0 %v122_v10  ;;  %587 = vmatpush.msra.mxu2 %v122_v10  ;;  %v317_v10 = vld [vmem:[#allocation10 + $0x50] sm:$0xff] }
  0x33   :  { %396 = vmatpush.msra.mxu1 %v383_v32  ;;  %599 = vmatpush.msra.mxu3 %v383_v32  ;;  %v312_v32 = vld [vmem:[#allocation10 + $0x28] sm:$0xff] }
  0x34   :  { %160 = vmatpush.msra.mxu0 %v121_v11  ;;  %588 = vmatpush.msra.mxu2 %v121_v11 }
  0x35   :  { %397 = vmatpush.msra.mxu1 %v382_v33  ;;  %600 = vmatpush.msra.mxu3 %v382_v33  ;;  %v354_v33 = vmul.f32 %v861_v49, %v319_v30 }
  0x36   :  { %161 = vmatpush.msra.mxu0 %v120_v12  ;;  %589 = vmatpush.msra.mxu2 %v120_v12  ;;  %v310_v12 = vld [vmem:[#allocation10 + $0x18] sm:$0xff] }
  0x37   :  { %398 = vmatpush.msra.mxu1 %v381_v36  ;;  %601 = vmatpush.msra.mxu3 %v381_v36  ;;  %v347_v36 = vmul.f32 %v861_v49, %v312_v32 }
  0x38   :  { %162 = vmatpush.msra.mxu0 %v119_v13  ;;  %590 = vmatpush.msra.mxu2 %v119_v13  ;;  %v352_v13 = vmul.f32 %v861_v49, %v317_v10  ;;  %v947_v10 = vstv %s576_s24 }
  0x39   :  { %399 = vmatpush.msra.mxu1 %v380_v37  ;;  %602 = vmatpush.msra.mxu3 %v380_v37 }
  0x3a   :  { %163 = vmatpush.msra.mxu0 %v118_v14  ;;  %591 = vmatpush.msra.mxu2 %v118_v14 }
  0x3b   :  { %400 = vmatpush.msra.mxu1 %v379_v38  ;;  %603 = vmatpush.msra.mxu3 %v379_v38 }
  0x3c   :  { %164 = vmatpush.msra.mxu0 %v117_v15  ;;  %592 = vmatpush.msra.mxu2 %v117_v15 }
  0x3d   :  { %165 = vmatmul.f32.vlgmr.msra.gmra.mxu0 %v133_v16  ;;  %189 = vmatmul.f32.vlgmr.msra.gmra.mxu2 %v141_v17  ;;  %v345_v16 = vmul.f32 %v861_v49, %v310_v12 }
  0x3e   :  { %401 = vmatpush.msra.mxu1 %v378_v39  ;;  %604 = vmatpush.msra.mxu3 %v378_v39 }
  0x40   :  { %402 = vmatpush.msra.mxu1 %v377_v42  ;;  %605 = vmatpush.msra.mxu3 %v377_v42  ;;  %v313_v42 = vld [vmem:[#allocation10 + $0x30] sm:$0xff] }
  0x42   :  { %403 = vmatpush.msra.mxu1 %v376_v45  ;;  %606 = vmatpush.msra.mxu3 %v376_v45 }
  0x44   :  { %404 = vmatpush.msra.mxu1 %v375_v46  ;;  %607 = vmatpush.msra.mxu3 %v375_v46  ;;  %v348_v46 = vmul.f32 %v861_v49, %v313_v42 }
  0x45   :  { %168 = vmatmul.f32.gmra.mxu0 %v134_v18  ;;  %192 = vmatmul.f32.gmra.mxu2 %v142_v19 }
  0x46   :  { %405 = vmatpush.msra.mxu1 %v374_v47  ;;  %608 = vmatpush.msra.mxu3 %v374_v47 }
  0x4d   :  { %171 = vmatmul.f32.gmra.mxu0 %v135_v20  ;;  %195 = vmatmul.f32.gmra.mxu2 %v143_v21  ;;  %v318_v20 = vld [vmem:[#allocation10 + $0x58] sm:$0xff] }
  0x55   :  { %174 = vmatmul.f32.gmra.mxu0 %v136_v22  ;;  %198 = vmatmul.f32.gmra.mxu2 %v144_v23  ;;  %v311_v22 = vld [vmem:[#allocation10 + $0x20] sm:$0xff]  ;;  %v353_v23 = vmul.f32 %v861_v49, %v318_v20  ;;  %v507_v20 = vld [vmem:[#allocation13 + $0x8] sm:$0xff] }
  0x56   :  { %v346_v26 = vmul.f32 %v861_v49, %v311_v22 }
  0x5d   :  { %177 = vmatmul.f32.gmra.mxu0 %v137_v28  ;;  %201 = vmatmul.f32.gmra.mxu2 %v145_v29 }
  0x65   :  { %180 = vmatmul.f32.gmra.mxu0 %v138_v34  ;;  %204 = vmatmul.f32.gmra.mxu2 %v146_v35 }
  0x6d   :  { %183 = vmatmul.f32.gmra.mxu0 %v139_v40  ;;  %207 = vmatmul.f32.gmra.mxu2 %v147_v41  ;;  %v320_v40 = vld [vmem:[#allocation10 + $0x68] sm:$0xff] }
  0x75   :  { %186 = vmatmul.f32.gmra.mxu0 %v140_v43  ;;  %210 = vmatmul.f32.gmra.mxu2 %v148_v44  ;;  %v355_v43 = vmul.f32 %v861_v49, %v320_v40 }
  0xba   :  { %v166_v52 = vpop.f32.mrf.mxu0 }
  0xbb   :  { %v325_v53 = vmul.f32 %v863_v50, %v166_v52  ;;  %v321_v52 = vld [vmem:[#allocation10 + $0x70] sm:$0xff] }
  0xbc   :  { %v356_v56 = vmul.f32 %v861_v49, %v321_v52 }
  0xbd   :  { %v867_v55 = vadd.f32 %v342_v51, %v325_v53 }
  0xbf   :  { %406 = vmatmul.f32.vlgmr.msra.gmra.mxu1 %v867_v55 }
  0xc0   :  { %v190_v58 = vpop.f32.mrf.mxu2 }
  0xc1   :  { %v333_v59 = vmul.f32 %v863_v50, %v190_v58 }
  0xc2   :  { %v169_v61 = vpop.f32.mrf.mxu0 }
  0xc3   :  { %v326_v62 = vmul.f32 %v863_v50, %v169_v61  ;;  %v874_v63 = vadd.f32 %v350_v57, %v333_v59  ;;  %v349_v59 = vmul.f32 %v861_v49, %v314_v54  ;;  %v516_v54 = vld [vmem:[#allocation13 + $0x50] sm:$0xff] }
  0xc5   :  { %430 = vmatmul.f32.vlgmr.msra.gmra.mxu3 %v874_v63  ;;  %v877_v1 = vadd.f32 %v343_v60, %v326_v62 }
  0xc7   :  { %409 = vmatmul.f32.gmra.mxu1 %v877_v1 }
  0xc8   :  { %v193_v4 = vpop.f32.mrf.mxu2 }
  0xc9   :  { %v334_v5 = vmul.f32 %v863_v50, %v193_v4 }
  0xca   :  { %v172_v7 = vpop.f32.mrf.mxu0 }
  0xcb   :  { %v327_v8 = vmul.f32 %v863_v50, %v172_v7  ;;  %v884_v9 = vadd.f32 %v351_v3, %v334_v5  ;;  %v357_v3 = vmul.f32 %v861_v49, %v322_v0  ;;  %v942_v7 = vstv %s472_s25  ;;  %v506_v49 = vld [vmem:[#allocation13] sm:$0xff] }
  0xcd   :  { %433 = vmatmul.f32.gmra.mxu3 %v884_v9  ;;  %v887_v11 = vadd.f32 %v344_v6, %v327_v8 }
  0xcf   :  { %412 = vmatmul.f32.gmra.mxu1 %v887_v11  ;;  %v476_v30 = vmul.f32 %v942_v7, %v887_v11 }
  0xd0   :  { %v196_v14 = vpop.f32.mrf.mxu2 }
  0xd1   :  { %v335_v15 = vmul.f32 %v863_v50, %v196_v14 }
  0xd2   :  { %v175_v17 = vpop.f32.mrf.mxu0 }
  0xd3   :  { %v328_v18 = vmul.f32 %v863_v50, %v175_v17  ;;  %v894_v19 = vadd.f32 %v352_v13, %v335_v15  ;;  %v474_v13 = vmul.f32 %v942_v7, %v867_v55  ;;  %v475_v17 = vmul.f32 %v942_v7, %v877_v1 }
  0xd5   :  { %436 = vmatmul.f32.gmra.mxu3 %v894_v19  ;;  %v897_v21 = vadd.f32 %v345_v16, %v328_v18 }
  0xd7   :  { %415 = vmatmul.f32.gmra.mxu1 %v897_v21  ;;  %v477_v11 = vmul.f32 %v942_v7, %v897_v21 }
  0xd8   :  { %v199_v24 = vpop.f32.mrf.mxu2 }
  0xd9   :  { %v336_v25 = vmul.f32 %v863_v50, %v199_v24  ;;  %v482_v24 = vmul.f32 %v942_v7, %v874_v63  ;;  %v483_v63 = vmul.f32 %v942_v7, %v884_v9  ;;  %v484_v9 = vmul.f32 %v942_v7, %v894_v19 }
  0xda   :  { %v178_v27 = vpop.f32.mrf.mxu0 }
  0xdb   :  { %v329_v28 = vmul.f32 %v863_v50, %v178_v27  ;;  %v904_v29 = vadd.f32 %v353_v23, %v336_v25 }
  0xdd   :  { %439 = vmatmul.f32.gmra.mxu3 %v904_v29  ;;  %v907_v31 = vadd.f32 %v346_v26, %v329_v28  ;;  %v514_v26 = vld [vmem:[#allocation13 + $0x40] sm:$0xff]  ;;  %v485_v19 = vmul.f32 %v942_v7, %v904_v29 }
  0xdf   :  { %418 = vmatmul.f32.gmra.mxu1 %v907_v31  ;;  %v478_v21 = vmul.f32 %v942_v7, %v907_v31 }
  0xe0   :  { %v202_v34 = vpop.f32.mrf.mxu2 }
  0xe1   :  { %v337_v35 = vmul.f32 %v863_v50, %v202_v34 }
  0xe2   :  { %v181_v37 = vpop.f32.mrf.mxu0 }
  0xe3   :  { %v330_v38 = vmul.f32 %v863_v50, %v181_v37  ;;  %v914_v39 = vadd.f32 %v354_v33, %v337_v35  ;;  %v508_v33 = vld [vmem:[#allocation13 + $0x10] sm:$0xff] }
  0xe5   :  { %442 = vmatmul.f32.gmra.mxu3 %v914_v39  ;;  %v917_v41 = vadd.f32 %v347_v36, %v330_v38  ;;  %v515_v38 = vld [vmem:[#allocation13 + $0x48] sm:$0xff]  ;;  %v486_v29 = vmul.f32 %v942_v7, %v914_v39 }
  0xe7   :  { %421 = vmatmul.f32.gmra.mxu1 %v917_v41  ;;  %v479_v31 = vmul.f32 %v942_v7, %v917_v41 }
  0xe8   :  { %v205_v44 = vpop.f32.mrf.mxu2 }
  0xe9   :  { %v338_v45 = vmul.f32 %v863_v50, %v205_v44 }
  0xea   :  { %v184_v47 = vpop.f32.mrf.mxu0 }
  0xeb   :  { %v331_v48 = vmul.f32 %v863_v50, %v184_v47  ;;  %v924_v51 = vadd.f32 %v355_v43, %v338_v45  ;;  %v509_v45 = vld [vmem:[#allocation13 + $0x18] sm:$0xff] }
  0xed   :  { %445 = vmatmul.f32.gmra.mxu3 %v924_v51  ;;  %v927_v53 = vadd.f32 %v348_v46, %v331_v48  ;;  %v487_v39 = vmul.f32 %v942_v7, %v924_v51 }
  0xef   :  { %424 = vmatmul.f32.gmra.mxu1 %v927_v53  ;;  %v480_v41 = vmul.f32 %v942_v7, %v927_v53 }
  0xf0   :  { %v208_v57 = vpop.f32.mrf.mxu2 }
  0xf1   :  { %v339_v58 = vmul.f32 %v863_v50, %v208_v57 }
  0xf2   :  { %v187_v60 = vpop.f32.mrf.mxu0 }
  0xf3   :  { %v332_v61 = vmul.f32 %v863_v50, %v187_v60  ;;  %v934_v62 = vadd.f32 %v356_v56, %v339_v58  ;;  %v510_v60 = vld [vmem:[#allocation13 + $0x20] sm:$0xff] }
  0xf5   :  { %448 = vmatmul.f32.gmra.mxu3 %v934_v62  ;;  %v937_v2 = vadd.f32 %v349_v59, %v332_v61  ;;  %v488_v51 = vmul.f32 %v942_v7, %v934_v62 }
  0xf7   :  { %427 = vmatmul.f32.gmra.mxu1 %v937_v2  ;;  %v481_v53 = vmul.f32 %v942_v7, %v937_v2 }
  0xf8   :  { %v211_v4 = vpop.f32.mrf.mxu2 }
  0xf9   :  { %v340_v5 = vmul.f32 %v863_v50, %v211_v4 }
  0xfb   :  { %v373_v6 = vadd.f32 %v357_v3, %v340_v5  ;;  %v517_v5 = vld [vmem:[#allocation13 + $0x58] sm:$0xff] }
  0xfd   :  { %451 = vmatmul.f32.gmra.mxu3 %v373_v6  ;;  %v945_v8 = vmul.f32 %v942_v7, %v373_v6 }
 0x13c   :  { %v407_v12 = vpop.f32.mrf.mxu1 }
 0x13d   :  { %v456_v14 = vmul.f32 %v947_v10, %v407_v12 }
 0x13f   :  { %v490_v15 = vadd.f32 %v474_v13, %v456_v14 }
 0x141   :  { %v522_v16 = vadd.f32 %v506_v49, %v490_v15  ;;  %v511_v49 = vld [vmem:[#allocation13 + $0x28] sm:$0xff] }
 0x143   :  { %538 = vst [vmem:[#allocation14] sm:$0xff] %v522_v16 }
 0x144   :  { %v410_v50 = vpop.f32.mrf.mxu1 }
 0x145   :  { %v457_v18 = vmul.f32 %v947_v10, %v410_v50 }
 0x147   :  { %v491_v22 = vadd.f32 %v475_v17, %v457_v18  ;;  %v518_v18 = vld [vmem:[#allocation13 + $0x60] sm:$0xff] }
 0x148   :  { %v431_v23 = vpop.f32.mrf.mxu3 }
 0x149   :  { %v523_v25 = vadd.f32 %v507_v20, %v491_v22  ;;  %v464_v55 = vmul.f32 %v947_v10, %v431_v23 }
 0x14b   :  { %539 = vst [vmem:[#allocation14 + $0x8] sm:$0xff] %v523_v25  ;;  %v498_v27 = vadd.f32 %v482_v24, %v464_v55  ;;  %v512_v25 = vld [vmem:[#allocation13 + $0x30] sm:$0xff] }
 0x14c   :  { %v413_v28 = vpop.f32.mrf.mxu1 }
 0x14d   :  { %v530_v32 = vadd.f32 %v514_v26, %v498_v27  ;;  %v458_v1 = vmul.f32 %v947_v10, %v413_v28 }
 0x14f   :  { %546 = vst [vmem:[#allocation14 + $0x40] sm:$0xff] %v530_v32  ;;  %v492_v34 = vadd.f32 %v476_v30, %v458_v1  ;;  %v519_v30 = vld [vmem:[#allocation13 + $0x68] sm:$0xff] }
 0x150   :  { %v434_v35 = vpop.f32.mrf.mxu3 }
 0x151   :  { %v524_v36 = vadd.f32 %v508_v33, %v492_v34  ;;  %v465_v37 = vmul.f32 %v947_v10, %v434_v35  ;;  %v513_v35 = vld [vmem:[#allocation13 + $0x38] sm:$0xff] }
 0x153   :  { %540 = vst [vmem:[#allocation14 + $0x10] sm:$0xff] %v524_v36  ;;  %v499_v40 = vadd.f32 %v483_v63, %v465_v37 }
 0x154   :  { %v416_v42 = vpop.f32.mrf.mxu1 }
 0x155   :  { %v531_v43 = vadd.f32 %v515_v38, %v499_v40  ;;  %v459_v44 = vmul.f32 %v947_v10, %v416_v42  ;;  %v520_v40 = vld [vmem:[#allocation13 + $0x70] sm:$0xff] }
 0x157   :  { %547 = vst [vmem:[#allocation14 + $0x48] sm:$0xff] %v531_v43  ;;  %v493_v46 = vadd.f32 %v477_v11, %v459_v44  ;;  %v521_v44 = vld [vmem:[#allocation13 + $0x78] sm:$0xff] }
 0x158   :  { %v437_v47 = vpop.f32.mrf.mxu3 }
 0x159   :  { %v525_v48 = vadd.f32 %v509_v45, %v493_v46  ;;  %v466_v52 = vmul.f32 %v947_v10, %v437_v47 }
 0x15b   :  { %541 = vst [vmem:[#allocation14 + $0x18] sm:$0xff] %v525_v48  ;;  %v500_v56 = vadd.f32 %v484_v9, %v466_v52 }
 0x15c   :  { %v419_v57 = vpop.f32.mrf.mxu1 }
 0x15d   :  { %v532_v58 = vadd.f32 %v516_v54, %v500_v56  ;;  %v460_v59 = vmul.f32 %v947_v10, %v419_v57 }
 0x15f   :  { %548 = vst [vmem:[#allocation14 + $0x50] sm:$0xff] %v532_v58  ;;  %v494_v61 = vadd.f32 %v478_v21, %v460_v59 }
 0x160   :  { %v440_v0 = vpop.f32.mrf.mxu3 }
 0x161   :  { %v526_v3 = vadd.f32 %v510_v60, %v494_v61  ;;  %v467_v4 = vmul.f32 %v947_v10, %v440_v0 }
 0x163   :  { %542 = vst [vmem:[#allocation14 + $0x20] sm:$0xff] %v526_v3  ;;  %v501_v6 = vadd.f32 %v485_v19, %v467_v4 }
 0x164   :  { %v422_v12 = vpop.f32.mrf.mxu1 }
 0x165   :  { %v533_v13 = vadd.f32 %v517_v5, %v501_v6  ;;  %v461_v14 = vmul.f32 %v947_v10, %v422_v12 }
 0x167   :  { %549 = vst [vmem:[#allocation14 + $0x58] sm:$0xff] %v533_v13  ;;  %v495_v15 = vadd.f32 %v479_v31, %v461_v14 }
 0x168   :  { %v443_v16 = vpop.f32.mrf.mxu3 }
 0x169   :  { %v527_v50 = vadd.f32 %v511_v49, %v495_v15  ;;  %v468_v17 = vmul.f32 %v947_v10, %v443_v16 }
 0x16b   :  { %543 = vst [vmem:[#allocation14 + $0x28] sm:$0xff] %v527_v50  ;;  %v502_v20 = vadd.f32 %v486_v29, %v468_v17 }
 0x16c   :  { %v425_v22 = vpop.f32.mrf.mxu1 }
 0x16d   :  { %v534_v23 = vadd.f32 %v518_v18, %v502_v20  ;;  %v462_v24 = vmul.f32 %v947_v10, %v425_v22 }
 0x16f   :  { %550 = vst [vmem:[#allocation14 + $0x60] sm:$0xff] %v534_v23  ;;  %v496_v55 = vadd.f32 %v480_v41, %v462_v24 }
 0x170   :  { %v446_v26 = vpop.f32.mrf.mxu3 }
 0x171   :  { %v528_v27 = vadd.f32 %v512_v25, %v496_v55  ;;  %v469_v28 = vmul.f32 %v947_v10, %v446_v26 }
 0x173   :  { %544 = vst [vmem:[#allocation14 + $0x30] sm:$0xff] %v528_v27  ;;  %v503_v32 = vadd.f32 %v487_v39, %v469_v28 }
 0x174   :  { %v428_v1 = vpop.f32.mrf.mxu1 }
 0x175   :  { %v535_v33 = vadd.f32 %v519_v30, %v503_v32  ;;  %v463_v34 = vmul.f32 %v947_v10, %v428_v1 }
 0x177   :  { %551 = vst [vmem:[#allocation14 + $0x68] sm:$0xff] %v535_v33  ;;  %v497_v63 = vadd.f32 %v481_v53, %v463_v34 }
 0x178   :  { %v449_v36 = vpop.f32.mrf.mxu3 }
 0x179   :  { %v529_v37 = vadd.f32 %v513_v35, %v497_v63  ;;  %v470_v38 = vmul.f32 %v947_v10, %v449_v36 }
 0x17b   :  { %545 = vst [vmem:[#allocation14 + $0x38] sm:$0xff] %v529_v37  ;;  %v504_v42 = vadd.f32 %v488_v51, %v470_v38 }
 0x17d   :  { %v536_v11 = vadd.f32 %v520_v40, %v504_v42 }
 0x17f   :  { %552 = vst [vmem:[#allocation14 + $0x70] sm:$0xff] %v536_v11 }
 0x180   :  { %v452_v43 = vpop.f32.mrf.mxu3 }
 0x181   :  { %v471_v2 = vmul.f32 %v947_v10, %v452_v43 }
 0x183   :  { %v505_v62 = vadd.f32 %v945_v8, %v471_v2 }
 0x185   :  { %v537_v7 = vadd.f32 %v521_v44, %v505_v62 }
 0x187   :  { %553 = vst [vmem:[#allocation14 + $0x78] sm:$0xff] %v537_v7 }
 0x188   :  { %566 = dma.vmem_to_hbm [thread:$0]  %s559_s27, 2048, %s561_s8, [#allocation5], %s785_s29, %s785_s29, %s786_s30  }
 0x189   :  { %782 = dma.done.wait [#allocation5], 2048  }
 0x18a   :  { %783 = vsyncadd [#allocation5], 4294965248 }
 0x18b   :  { %571 = vsyncpa [#allocation4], 1 }
 0x18c   :  { %572 = vsyncpa [#allocation9], 1 }
 0x18d   :  { %573 = vsyncpa [#allocation12], 1 }
 0x18e   :  { %574 = vsyncpa [#allocation5], 1 }
 0x18f   :  { %575 = vsyncpa [#allocation6], 1 }

</bundles_post_ra>
